<compile_context>
chip_gen: v5e
topology: v5e:2x2
jax: 0.10.0
libtpu: 0.0.40
codegen_flags: <defaults>
</compile_context>

<pallas_src>
import jax
import jax.numpy as jnp
from jax.experimental import pallas as pl
from jax.experimental.pallas import tpu as pltpu

POSE_BLOCK = 32        # poses per grid step -> 4*32 = 128 lanes (full vreg-row, unmasked vst)
_SMALL_TH2 = 4e-2      # Taylor branch for theta < 0.2 rad (float32-stable on both sides)


def pose_forward_kernel(se3_ref, rt_ref, out_ref):
    """One block of POSE_BLOCK poses.

    se3_ref : (6, 4*PB)  row c, lane 4b+j = se3[b, c]   (group-broadcast over j)
    rt_ref  : (4, 4*PB)  row k, lane 4b+j = Rt[b, k, j]
    out_ref : (4, 4*PB)  row i, lane 4b+j = (Exp(se3_b).matrix() @ Rt_b)[i, j]
    """
    v0 = se3_ref[0:1, :]
    v1 = se3_ref[1:2, :]
    v2 = se3_ref[2:3, :]
    w0 = se3_ref[3:4, :]
    w1 = se3_ref[4:5, :]
    w2 = se3_ref[5:6, :]

    # ---- Rodrigues / left-Jacobian coefficients (elementwise over (1, 4*PB)) -------------
    w00 = w0 * w0
    w11 = w1 * w1
    w22 = w2 * w2
    th2 = w00 + w11 + w22
    small = th2 < _SMALL_TH2
    th2s = jnp.where(small, 1.0, th2)
    th = jnp.sqrt(th2s)
    sin_th = jnp.sin(th)
    sin_half = jnp.sin(0.5 * th)
    th4 = th2 * th2

    # A = sin(t)/t ; B = (1-cos t)/t^2 ; C = (t - sin t)/t^3
    A = jnp.where(small, 1.0 - th2 * (1.0 / 6.0) + th4 * (1.0 / 120.0), sin_th / th)
    B = jnp.where(small, 0.5 - th2 * (1.0 / 24.0) + th4 * (1.0 / 720.0),
                  2.0 * sin_half * sin_half / th2s)
    C = jnp.where(small, 1.0 / 6.0 - th2 * (1.0 / 120.0) + th4 * (1.0 / 5040.0),
                  (th - sin_th) / (th2s * th))

    # ---- K = skew(omega) and K^2 entries in closed form ----------------------------------
    w01 = w0 * w1
    w02 = w0 * w2
    w12 = w1 * w2
    kk00 = -(w11 + w22)
    kk11 = -(w00 + w22)
    kk22 = -(w00 + w11)

    # Rotation block R = I + A K + B K^2
    r00 = 1.0 + B * kk00
    r01 = B * w01 - A * w2
    r02 = B * w02 + A * w1
    r10 = B * w01 + A * w2
    r11 = 1.0 + B * kk11
    r12 = B * w12 - A * w0
    r20 = B * w02 - A * w1
    r21 = B * w12 + A * w0
    r22 = 1.0 + B * kk22

    # Left Jacobian V = I + B K + C K^2 ; translation t = V @ tau
    V00 = 1.0 + C * kk00
    V01 = C * w01 - B * w2
    V02 = C * w02 + B * w1
    V10 = C * w01 + B * w2
    V11 = 1.0 + C * kk11
    V12 = C * w12 - B * w0
    V20 = C * w02 - B * w1
    V21 = C * w12 + B * w0
    V22 = 1.0 + C * kk22
    t0 = V00 * v0 + V01 * v1 + V02 * v2
    t1 = V10 * v0 + V11 * v1 + V12 * v2
    t2 = V20 * v0 + V21 * v1 + V22 * v2

    # ---- dRt @ Rt : block-diagonal 4x4 contraction on the VPU (deliberately off the MXU) --
    T0 = rt_ref[0:1, :]
    T1 = rt_ref[1:2, :]
    T2 = rt_ref[2:3, :]
    T3 = rt_ref[3:4, :]
    row0 = r00 * T0 + r01 * T1 + r02 * T2 + t0 * T3
    row1 = r10 * T0 + r11 * T1 + r12 * T2 + t1 * T3
    row2 = r20 * T0 + r21 * T1 + r22 * T2 + t2 * T3
    out_ref[0:1, :] = row0
    out_ref[1:2, :] = row1
    out_ref[2:3, :] = row2
    out_ref[3:4, :] = T3          # dRt bottom row is [0, 0, 0, 1]


def _pose_forward_slab(se3_rep, rt_slab):
    """se3_rep: (6, 4*B), rt_slab: (4, 4*B) with B a multiple of POSE_BLOCK."""
    lanes = rt_slab.shape[1]
    blk = 4 * POSE_BLOCK
    nblk = lanes // blk
    return pl.pallas_call(
        pose_forward_kernel,
        out_shape=jax.ShapeDtypeStruct((4, lanes), jnp.float32),
        grid=(nblk,),
        in_specs=[
            pl.BlockSpec((6, blk), lambda i: (0, i)),
            pl.BlockSpec((4, blk), lambda i: (0, i)),
        ],
        out_specs=pl.BlockSpec((4, blk), lambda i: (0, i)),
        input_output_aliases={1: 0},   # Rt slab updated in place (P8)
        compiler_params=pltpu.CompilerParams(
            dimension_semantics=("parallel",)),   # shards pose blocks across TCs on v7x
    )(se3_rep, rt_slab)


@jax.jit
def pose_forward_batched(se3, Rt):
    """Batched Pose.forward(): se3 (B, 6), Rt (B, 4, 4) -> (B, 4, 4) float32."""
    se3 = jnp.asarray(se3, jnp.float32)
    Rt = jnp.asarray(Rt, jnp.float32)
    B = se3.shape[0]
    Bp = pl.cdiv(B, POSE_BLOCK) * POSE_BLOCK
    pad = Bp - B
    if pad:
        se3 = jnp.concatenate([se3, jnp.zeros((pad, 6), jnp.float32)], axis=0)
        eye = jnp.broadcast_to(jnp.eye(4, dtype=jnp.float32), (pad, 4, 4))
        Rt = jnp.concatenate([Rt, eye], axis=0)
    # Layout plumbing only: present lane-dense slabs (group-broadcast se3, (4, 4B) Rt/out).
    se3_rep = jnp.repeat(se3.T, 4, axis=1)                       # (6, 4*Bp)
    rt_slab = jnp.transpose(Rt, (1, 0, 2)).reshape(4, 4 * Bp)    # (4, 4*Bp)
    out_slab = _pose_forward_slab(se3_rep, rt_slab)
    return jnp.transpose(out_slab.reshape(4, Bp, 4), (1, 0, 2))[:B]


def pose_forward(se3, Rt, is_learnable=True):
    """Single-pose Pose.forward() (the module's exact semantics)."""
    Rt = jnp.asarray(Rt, jnp.float32)
    if not is_learnable:
        return Rt
    se3 = jnp.asarray(se3, jnp.float32)
    return pose_forward_batched(se3[None, :], Rt[None, :, :])[0]


def _reference_forward_batched(se3, Rt):
    """Pure-JAX reference of pp.se3(se3).Exp().matrix() @ Rt (batched)."""
    se3 = jnp.asarray(se3, jnp.float32)
    Rt = jnp.asarray(Rt, jnp.float32)
    tau, w = se3[:, :3], se3[:, 3:]
    w0, w1, w2 = w[:, 0], w[:, 1], w[:, 2]
    z = jnp.zeros_like(w0)
    K = jnp.stack([jnp.stack([z, -w2, w1], -1),
                   jnp.stack([w2, z, -w0], -1),
                   jnp.stack([-w1, w0, z], -1)], -2)             # (B, 3, 3)
    th2 = jnp.sum(w * w, axis=-1)[:, None, None]
    small = th2 < _SMALL_TH2
    th2s = jnp.where(small, 1.0, th2)
    th = jnp.sqrt(th2s)
    th4 = th2 * th2
    A = jnp.where(small, 1.0 - th2 / 6.0 + th4 / 120.0, jnp.sin(th) / th)
    Bc = jnp.where(small, 0.5 - th2 / 24.0 + th4 / 720.0,
                   2.0 * jnp.sin(0.5 * th) ** 2 / th2s)
    Cc = jnp.where(small, 1.0 / 6.0 - th2 / 120.0 + th4 / 5040.0,
                   (th - jnp.sin(th)) / (th2s * th))
    hi = jax.lax.Precision.HIGHEST
    K2 = jnp.matmul(K, K, precision=hi)
    eye = jnp.eye(3, dtype=jnp.float32)
    R = eye + A * K + Bc * K2
    V = eye + Bc * K + Cc * K2
    t = jnp.einsum("bij,bj->bi", V, tau, precision=hi)
    Bn = se3.shape[0]
    dRt = (jnp.zeros((Bn, 4, 4), jnp.float32)
           .at[:, :3, :3].set(R)
           .at[:, :3, 3].set(t)
           .at[:, 3, 3].set(1.0))
    return jnp.matmul(dRt, Rt, precision=hi)


if __name__ == "__main__":
    key = jax.random.PRNGKey(0)
    k1, k2, k3 = jax.random.split(key, 3)

    # Deterministic "parameters": a batch of learnable se3 twists and stored Rt buffers.
    B = 64
    tau = 0.5 * jax.random.normal(k1, (B, 3), dtype=jnp.float32)
    omega = 0.4 * jax.random.normal(k2, (B, 3), dtype=jnp.float32)
    omega = omega.at[:8].multiply(1e-3)          # exercise the small-angle (Taylor) branch
    se3 = jnp.concatenate([tau, omega], axis=-1)

    Rt_top = jax.random.normal(k3, (B, 3, 4), dtype=jnp.float32)
    bottom = jnp.broadcast_to(
        jnp.array([[[0.0, 0.0, 0.0, 1.0]]], dtype=jnp.float32), (B, 1, 4))
    Rt = jnp.concatenate([Rt_top, bottom], axis=1)

    out = jax.block_until_ready(pose_forward_batched(se3, Rt))
    ref = _reference_forward_batched(se3, Rt)
    assert out.shape == (B, 4, 4) and out.dtype == jnp.float32
    assert jnp.allclose(out, ref, atol=1e-4, rtol=1e-4), (out[:2], ref[:2])

    # Single-pose module semantics (Pose.forward()).
    out1 = jax.block_until_ready(pose_forward(se3[0], Rt[0]))
    assert jnp.allclose(out1, ref[0], atol=1e-4, rtol=1e-4), (out1, ref[0])

    print("KERNEL_OK")
</pallas_src>

<mosaic_0001>
module attributes {stable_mosaic.version = 11 : i64} {
  func.func @pose_forward_kernel(%arg0: i32, %arg1: memref<6x128xf32, #tpu.memory_space<vmem>>, %arg2: memref<4x128xf32, #tpu.memory_space<vmem>>, %arg3: memref<4x128xf32, #tpu.memory_space<vmem>>) attributes {dimension_semantics = [#tpu.dimension_semantics<parallel>], iteration_bounds = array<i64: 2>, scalar_prefetch = 0 : i64, scratch_operands = 0 : i64, tpu.core_type = #tpu.core_type<tc>, window_params = [{transform_indices = @transform_0, window_bounds = array<i64: 6, 128>}, {transform_indices = @transform_1, window_bounds = array<i64: 4, 128>}, {transform_indices = @transform_2, window_bounds = array<i64: 4, 128>}]} {
    %c0 = arith.constant 0 : index
    %c0_0 = arith.constant 0 : index
    %0 = vector.load %arg1[%c0, %c0_0] : memref<6x128xf32, #tpu.memory_space<vmem>>, vector<1x128xf32>
    %c1 = arith.constant 1 : index
    %c0_1 = arith.constant 0 : index
    %1 = vector.load %arg1[%c1, %c0_1] : memref<6x128xf32, #tpu.memory_space<vmem>>, vector<1x128xf32>
    %c2 = arith.constant 2 : index
    %c0_2 = arith.constant 0 : index
    %2 = vector.load %arg1[%c2, %c0_2] : memref<6x128xf32, #tpu.memory_space<vmem>>, vector<1x128xf32>
    %c3 = arith.constant 3 : index
    %c0_3 = arith.constant 0 : index
    %3 = vector.load %arg1[%c3, %c0_3] : memref<6x128xf32, #tpu.memory_space<vmem>>, vector<1x128xf32>
    %c4 = arith.constant 4 : index
    %c0_4 = arith.constant 0 : index
    %4 = vector.load %arg1[%c4, %c0_4] : memref<6x128xf32, #tpu.memory_space<vmem>>, vector<1x128xf32>
    %c5 = arith.constant 5 : index
    %c0_5 = arith.constant 0 : index
    %5 = vector.load %arg1[%c5, %c0_5] : memref<6x128xf32, #tpu.memory_space<vmem>>, vector<1x128xf32>
    %6 = arith.mulf %3, %3 : vector<1x128xf32>
    %7 = arith.mulf %4, %4 : vector<1x128xf32>
    %8 = arith.mulf %5, %5 : vector<1x128xf32>
    %9 = arith.addf %6, %7 : vector<1x128xf32>
    %10 = arith.addf %9, %8 : vector<1x128xf32>
    %cst = arith.constant 4.000000e-02 : f32
    %11 = vector.broadcast %cst : f32 to vector<1x128xf32>
    %12 = arith.cmpf olt, %10, %11 : vector<1x128xf32>
    %cst_6 = arith.constant 1.000000e+00 : f32
    %13 = vector.broadcast %cst_6 : f32 to vector<1x128xf32>
    %14 = arith.select %12, %13, %10 : vector<1x128xi1>, vector<1x128xf32>
    %15 = math.sqrt %14 : vector<1x128xf32>
    %16 = math.sin %15 : vector<1x128xf32>
    %cst_7 = arith.constant 5.000000e-01 : f32
    %17 = vector.broadcast %cst_7 : f32 to vector<1x128xf32>
    %18 = arith.mulf %17, %15 : vector<1x128xf32>
    %19 = math.sin %18 : vector<1x128xf32>
    %20 = arith.mulf %10, %10 : vector<1x128xf32>
    %cst_8 = arith.constant 0.166666672 : f32
    %21 = vector.broadcast %cst_8 : f32 to vector<1x128xf32>
    %22 = arith.mulf %10, %21 : vector<1x128xf32>
    %cst_9 = arith.constant 1.000000e+00 : f32
    %23 = vector.broadcast %cst_9 : f32 to vector<1x128xf32>
    %24 = arith.subf %23, %22 : vector<1x128xf32>
    %cst_10 = arith.constant 0.00833333377 : f32
    %25 = vector.broadcast %cst_10 : f32 to vector<1x128xf32>
    %26 = arith.mulf %20, %25 : vector<1x128xf32>
    %27 = arith.addf %24, %26 : vector<1x128xf32>
    %28 = arith.divf %16, %15 : vector<1x128xf32>
    %29 = arith.select %12, %27, %28 : vector<1x128xi1>, vector<1x128xf32>
    %cst_11 = arith.constant 0.0416666679 : f32
    %30 = vector.broadcast %cst_11 : f32 to vector<1x128xf32>
    %31 = arith.mulf %10, %30 : vector<1x128xf32>
    %cst_12 = arith.constant 5.000000e-01 : f32
    %32 = vector.broadcast %cst_12 : f32 to vector<1x128xf32>
    %33 = arith.subf %32, %31 : vector<1x128xf32>
    %cst_13 = arith.constant 0.00138888892 : f32
    %34 = vector.broadcast %cst_13 : f32 to vector<1x128xf32>
    %35 = arith.mulf %20, %34 : vector<1x128xf32>
    %36 = arith.addf %33, %35 : vector<1x128xf32>
    %cst_14 = arith.constant 2.000000e+00 : f32
    %37 = vector.broadcast %cst_14 : f32 to vector<1x128xf32>
    %38 = arith.mulf %37, %19 : vector<1x128xf32>
    %39 = arith.mulf %38, %19 : vector<1x128xf32>
    %40 = arith.divf %39, %14 : vector<1x128xf32>
    %41 = arith.select %12, %36, %40 : vector<1x128xi1>, vector<1x128xf32>
    %cst_15 = arith.constant 0.00833333377 : f32
    %42 = vector.broadcast %cst_15 : f32 to vector<1x128xf32>
    %43 = arith.mulf %10, %42 : vector<1x128xf32>
    %cst_16 = arith.constant 0.166666672 : f32
    %44 = vector.broadcast %cst_16 : f32 to vector<1x128xf32>
    %45 = arith.subf %44, %43 : vector<1x128xf32>
    %cst_17 = arith.constant 1.98412701E-4 : f32
    %46 = vector.broadcast %cst_17 : f32 to vector<1x128xf32>
    %47 = arith.mulf %20, %46 : vector<1x128xf32>
    %48 = arith.addf %45, %47 : vector<1x128xf32>
    %49 = arith.subf %15, %16 : vector<1x128xf32>
    %50 = arith.mulf %14, %15 : vector<1x128xf32>
    %51 = arith.divf %49, %50 : vector<1x128xf32>
    %52 = arith.select %12, %48, %51 : vector<1x128xi1>, vector<1x128xf32>
    %53 = arith.mulf %3, %4 : vector<1x128xf32>
    %54 = arith.mulf %3, %5 : vector<1x128xf32>
    %55 = arith.mulf %4, %5 : vector<1x128xf32>
    %56 = arith.addf %7, %8 : vector<1x128xf32>
    %cst_18 = arith.constant 0.000000e+00 : f32
    %57 = vector.broadcast %cst_18 : f32 to vector<1x128xf32>
    %58 = arith.subf %57, %56 : vector<1x128xf32>
    %59 = arith.addf %6, %8 : vector<1x128xf32>
    %cst_19 = arith.constant 0.000000e+00 : f32
    %60 = vector.broadcast %cst_19 : f32 to vector<1x128xf32>
    %61 = arith.subf %60, %59 : vector<1x128xf32>
    %62 = arith.addf %6, %7 : vector<1x128xf32>
    %cst_20 = arith.constant 0.000000e+00 : f32
    %63 = vector.broadcast %cst_20 : f32 to vector<1x128xf32>
    %64 = arith.subf %63, %62 : vector<1x128xf32>
    %65 = arith.mulf %41, %58 : vector<1x128xf32>
    %cst_21 = arith.constant 1.000000e+00 : f32
    %66 = vector.broadcast %cst_21 : f32 to vector<1x128xf32>
    %67 = arith.addf %66, %65 : vector<1x128xf32>
    %68 = arith.mulf %41, %53 : vector<1x128xf32>
    %69 = arith.mulf %29, %5 : vector<1x128xf32>
    %70 = arith.subf %68, %69 : vector<1x128xf32>
    %71 = arith.mulf %41, %54 : vector<1x128xf32>
    %72 = arith.mulf %29, %4 : vector<1x128xf32>
    %73 = arith.addf %71, %72 : vector<1x128xf32>
    %74 = arith.mulf %41, %53 : vector<1x128xf32>
    %75 = arith.mulf %29, %5 : vector<1x128xf32>
    %76 = arith.addf %74, %75 : vector<1x128xf32>
    %77 = arith.mulf %41, %61 : vector<1x128xf32>
    %cst_22 = arith.constant 1.000000e+00 : f32
    %78 = vector.broadcast %cst_22 : f32 to vector<1x128xf32>
    %79 = arith.addf %78, %77 : vector<1x128xf32>
    %80 = arith.mulf %41, %55 : vector<1x128xf32>
    %81 = arith.mulf %29, %3 : vector<1x128xf32>
    %82 = arith.subf %80, %81 : vector<1x128xf32>
    %83 = arith.mulf %41, %54 : vector<1x128xf32>
    %84 = arith.mulf %29, %4 : vector<1x128xf32>
    %85 = arith.subf %83, %84 : vector<1x128xf32>
    %86 = arith.mulf %41, %55 : vector<1x128xf32>
    %87 = arith.mulf %29, %3 : vector<1x128xf32>
    %88 = arith.addf %86, %87 : vector<1x128xf32>
    %89 = arith.mulf %41, %64 : vector<1x128xf32>
    %cst_23 = arith.constant 1.000000e+00 : f32
    %90 = vector.broadcast %cst_23 : f32 to vector<1x128xf32>
    %91 = arith.addf %90, %89 : vector<1x128xf32>
    %92 = arith.mulf %52, %58 : vector<1x128xf32>
    %cst_24 = arith.constant 1.000000e+00 : f32
    %93 = vector.broadcast %cst_24 : f32 to vector<1x128xf32>
    %94 = arith.addf %93, %92 : vector<1x128xf32>
    %95 = arith.mulf %52, %53 : vector<1x128xf32>
    %96 = arith.mulf %41, %5 : vector<1x128xf32>
    %97 = arith.subf %95, %96 : vector<1x128xf32>
    %98 = arith.mulf %52, %54 : vector<1x128xf32>
    %99 = arith.mulf %41, %4 : vector<1x128xf32>
    %100 = arith.addf %98, %99 : vector<1x128xf32>
    %101 = arith.mulf %52, %53 : vector<1x128xf32>
    %102 = arith.mulf %41, %5 : vector<1x128xf32>
    %103 = arith.addf %101, %102 : vector<1x128xf32>
    %104 = arith.mulf %52, %61 : vector<1x128xf32>
    %cst_25 = arith.constant 1.000000e+00 : f32
    %105 = vector.broadcast %cst_25 : f32 to vector<1x128xf32>
    %106 = arith.addf %105, %104 : vector<1x128xf32>
    %107 = arith.mulf %52, %55 : vector<1x128xf32>
    %108 = arith.mulf %41, %3 : vector<1x128xf32>
    %109 = arith.subf %107, %108 : vector<1x128xf32>
    %110 = arith.mulf %52, %54 : vector<1x128xf32>
    %111 = arith.mulf %41, %4 : vector<1x128xf32>
    %112 = arith.subf %110, %111 : vector<1x128xf32>
    %113 = arith.mulf %52, %55 : vector<1x128xf32>
    %114 = arith.mulf %41, %3 : vector<1x128xf32>
    %115 = arith.addf %113, %114 : vector<1x128xf32>
    %116 = arith.mulf %52, %64 : vector<1x128xf32>
    %cst_26 = arith.constant 1.000000e+00 : f32
    %117 = vector.broadcast %cst_26 : f32 to vector<1x128xf32>
    %118 = arith.addf %117, %116 : vector<1x128xf32>
    %119 = arith.mulf %94, %0 : vector<1x128xf32>
    %120 = arith.mulf %97, %1 : vector<1x128xf32>
    %121 = arith.addf %119, %120 : vector<1x128xf32>
    %122 = arith.mulf %100, %2 : vector<1x128xf32>
    %123 = arith.addf %121, %122 : vector<1x128xf32>
    %124 = arith.mulf %103, %0 : vector<1x128xf32>
    %125 = arith.mulf %106, %1 : vector<1x128xf32>
    %126 = arith.addf %124, %125 : vector<1x128xf32>
    %127 = arith.mulf %109, %2 : vector<1x128xf32>
    %128 = arith.addf %126, %127 : vector<1x128xf32>
    %129 = arith.mulf %112, %0 : vector<1x128xf32>
    %130 = arith.mulf %115, %1 : vector<1x128xf32>
    %131 = arith.addf %129, %130 : vector<1x128xf32>
    %132 = arith.mulf %118, %2 : vector<1x128xf32>
    %133 = arith.addf %131, %132 : vector<1x128xf32>
    %c0_27 = arith.constant 0 : index
    %c0_28 = arith.constant 0 : index
    %134 = vector.load %arg2[%c0_27, %c0_28] : memref<4x128xf32, #tpu.memory_space<vmem>>, vector<1x128xf32>
    %c1_29 = arith.constant 1 : index
    %c0_30 = arith.constant 0 : index
    %135 = vector.load %arg2[%c1_29, %c0_30] : memref<4x128xf32, #tpu.memory_space<vmem>>, vector<1x128xf32>
    %c2_31 = arith.constant 2 : index
    %c0_32 = arith.constant 0 : index
    %136 = vector.load %arg2[%c2_31, %c0_32] : memref<4x128xf32, #tpu.memory_space<vmem>>, vector<1x128xf32>
    %c3_33 = arith.constant 3 : index
    %c0_34 = arith.constant 0 : index
    %137 = vector.load %arg2[%c3_33, %c0_34] : memref<4x128xf32, #tpu.memory_space<vmem>>, vector<1x128xf32>
    %138 = arith.mulf %67, %134 : vector<1x128xf32>
    %139 = arith.mulf %70, %135 : vector<1x128xf32>
    %140 = arith.addf %138, %139 : vector<1x128xf32>
    %141 = arith.mulf %73, %136 : vector<1x128xf32>
    %142 = arith.addf %140, %141 : vector<1x128xf32>
    %143 = arith.mulf %123, %137 : vector<1x128xf32>
    %144 = arith.addf %142, %143 : vector<1x128xf32>
    %145 = arith.mulf %76, %134 : vector<1x128xf32>
    %146 = arith.mulf %79, %135 : vector<1x128xf32>
    %147 = arith.addf %145, %146 : vector<1x128xf32>
    %148 = arith.mulf %82, %136 : vector<1x128xf32>
    %149 = arith.addf %147, %148 : vector<1x128xf32>
    %150 = arith.mulf %128, %137 : vector<1x128xf32>
    %151 = arith.addf %149, %150 : vector<1x128xf32>
    %152 = arith.mulf %85, %134 : vector<1x128xf32>
    %153 = arith.mulf %88, %135 : vector<1x128xf32>
    %154 = arith.addf %152, %153 : vector<1x128xf32>
    %155 = arith.mulf %91, %136 : vector<1x128xf32>
    %156 = arith.addf %154, %155 : vector<1x128xf32>
    %157 = arith.mulf %133, %137 : vector<1x128xf32>
    %158 = arith.addf %156, %157 : vector<1x128xf32>
    %c0_35 = arith.constant 0 : index
    %c0_36 = arith.constant 0 : index
    %159 = vector.load %arg3[%c0_35, %c0_36] : memref<4x128xf32, #tpu.memory_space<vmem>>, vector<1x128xf32>
    tpu.vector_store %arg3[%c0_35, %c0_36], %144 {strides = array<i32>} : memref<4x128xf32, #tpu.memory_space<vmem>>, vector<1x128xf32>,
    %c1_37 = arith.constant 1 : index
    %c0_38 = arith.constant 0 : index
    %160 = vector.load %arg3[%c1_37, %c0_38] : memref<4x128xf32, #tpu.memory_space<vmem>>, vector<1x128xf32>
    tpu.vector_store %arg3[%c1_37, %c0_38], %151 {strides = array<i32>} : memref<4x128xf32, #tpu.memory_space<vmem>>, vector<1x128xf32>,
    %c2_39 = arith.constant 2 : index
    %c0_40 = arith.constant 0 : index
    %161 = vector.load %arg3[%c2_39, %c0_40] : memref<4x128xf32, #tpu.memory_space<vmem>>, vector<1x128xf32>
    tpu.vector_store %arg3[%c2_39, %c0_40], %158 {strides = array<i32>} : memref<4x128xf32, #tpu.memory_space<vmem>>, vector<1x128xf32>,
    %c3_41 = arith.constant 3 : index
    %c0_42 = arith.constant 0 : index
    %162 = vector.load %arg3[%c3_41, %c0_42] : memref<4x128xf32, #tpu.memory_space<vmem>>, vector<1x128xf32>
    tpu.vector_store %arg3[%c3_41, %c0_42], %137 {strides = array<i32>} : memref<4x128xf32, #tpu.memory_space<vmem>>, vector<1x128xf32>,
    return
  }
  func.func @transform_0(%arg0: i32) -> (i32, i32) {
    %c0_i32 = arith.constant 0 : i32
    %c0_i32_0 = arith.constant 0 : i32
    return %c0_i32, %arg0 : i32, i32
  }
  func.func @transform_1(%arg0: i32) -> (i32, i32) {
    %c0_i32 = arith.constant 0 : i32
    %c0_i32_0 = arith.constant 0 : i32
    return %c0_i32, %arg0 : i32, i32
  }
  func.func @transform_2(%arg0: i32) -> (i32, i32) {
    %c0_i32 = arith.constant 0 : i32
    %c0_i32_0 = arith.constant 0 : i32
    return %c0_i32, %arg0 : i32, i32
  }
}

</mosaic_0001>

<bundles_post_ra>
// kernel: pose_forward_batched.1
= control target key start
LH: loop header
LB: loop body
LE: loop exit
PB: predicated region body
PF: predicated region fallthrough
CT: control target
= control target key end

     0   :  { %s779_s9 = smov 0   ;;  %s1147_s0 = inlined_call_operand.vmem [shape: f32[6,256], index: 0, kind: input, shape index: {}]   ;;  %s1148_s1 = inlined_call_operand.vmem [shape: f32[4,256], index: 1, kind: input, shape index: {}, may-alias: {1,2}]   ;;  %s1149_s2 = inlined_call_operand.vmem [shape: f32[4,256], index: 2, kind: output, shape index: {}, may-alias: {1,2}]  }
   0x1 LB: > { %s710_s10 = sadd.s32 4294967295, %s755_s9   ;;  %p714_p0 = scmp.ge.s32.totalorder %s755_s9, 1  ;;  %s755_s9 = sphi %s779_s9, %s12_s9  }
   0x2   : > { %p120_p1 = scmp.lt.s32.totalorder %s755_s9, 3 }
   0x4   : > { %p121_p2 = pnand %p714_p0, %p120_p1 }
   0x5   : > { %p144_p3 = scmp.lt.s32.totalorder (!%p121_p2), %s710_s10, 1 }
   0x6   : > { %124 = sbr.rel (%p121_p2) target bundleno = 185 (0xb9), region = 28 }
   0xb   : > { %s1159_s10 = smov (!%p144_p3, %s710_s10), 1  ;;  %v757_v39 = vmov 683565275   ;;  %v758_v41 = vmov 2475754826  }
   0xc   : > { %s715_s11 = sshll.u32 %s1159_s10, 3  ;;  %v759_v43 = vmov 2131351028   ;;  %v760_v45 = vmov 2102212464   ;;  %s716_s15 = sshll.u32 %s1159_s10, 2 }
   0xd   : > { %s793_s14 = scalar_lea.vmem %s1147_s0, %s715_s11  ;;  %v761_v47 = vmov 920167782   ;;  %v762_v56 = vmov 1326507024   ;;  %s151_s18 = scalar_lea.vmem %s1148_s1, %s716_s15 }
   0xe   : > { %v796_v0 = vld [vmem:[%s793_s14 + $0x3] sm:$0x1]  ;;  %v799_v1 = vld [vmem:[%s793_s14 + $0x4] sm:$0x1]  ;;  %v802_v2 = vld [vmem:[%s793_s14 + $0x5] sm:$0x1]  ;;  %s1045_s21 = scalar_lea.vmem %s1149_s2, %s716_s15 }
   0xf   : > { %v806_v3 = vmul.f32 %v796_v0, %v796_v0  ;;  %v810_v4 = vmul.f32 %v799_v1, %v799_v1  ;;  %v814_v5 = vmul.f32 %v802_v2, %v802_v2 }
  0x11   : > { %v818_v6 = vadd.f32 %v810_v4, %v806_v3 }
  0x13   : > { %v822_v7 = vadd.f32 %v818_v6, %v814_v5 }
  0x15   : > { %vm167_vm0 = vcmp.lt.f32.partialorder %v822_v7, 0.04 }
  0x16   : > { %v828_v8 = vsel %vm167_vm0, 1.0, %v822_v7 }
  0x17   : > { %741 = vrsqrt.f32 %v828_v8  ;;  %vm176_vm1 = vcmp.eq.f32.partialorder %v828_v8, inf  ;;  %v179_v15 = vand.u32 2147483648, %v828_v8  ;;  %vm178_vm2 = vcmp.eq.f32.partialorder %v828_v8, 0.0 }
  0x1d   : > { %v742_v9 = vpop.eup %741 }
  0x1e   : > { %v170_v10 = vmul.f32 %v742_v9, %v828_v8 }
  0x20   : > { %v171_v11 = vmul.f32 %v742_v9, %v170_v10 }
  0x22   : > { %v172_v12 = vmul.f32 0.5, %v171_v11 }
  0x24   : > { %v173_v13 = vsub.f32 1.5, %v172_v12 }
  0x26   : > { %v174_v14 = vmul.f32 %v742_v9, %v173_v13 }
  0x28   : > { %v175_v16 = vmul.f32 %v174_v14, %v828_v8 }
  0x2a   : > { %v177_v17 = vsel %vm176_vm1, %v828_v8, %v175_v16 }
  0x2b   : > { %v839_v18 = vsel %vm178_vm2, %v179_v15, %v177_v17 }
  0x2c   : > { %v842_v19 = vand.u32 2147483647, %v839_v18  ;;  %v184_v20 = vand.u32 2139095040, %v839_v18  ;;  %v846_v21 = vmul.f32 0.5, %v839_v18  ;;  %743 = vrcp.f32 %v839_v18 }
  0x2e   : > { %v185_v22 = vshrl.u32 %v184_v20, 23  ;;  %v188_v23 = vand.u32 8388607, %v842_v19  ;;  %v340_v24 = vand.u32 2139095040, %v846_v21  ;;  %v337_v25 = vand.u32 2147483647, %v846_v21 }
  0x30   : > { %v718_v26 = vadd.s32 4294967169, %v185_v22  ;;  %v341_v27 = vshrl.u32 %v340_v24, 23  ;;  %v189_v28 = vor.u32 8388608, %v188_v23  ;;  %v344_v31 = vand.u32 8388607, %v337_v25 }
  0x32   : > { %v191_v29 = vadd.s32 1, %v718_v26  ;;  %v721_v30 = vadd.s32 4294967169, %v341_v27  ;;  %v853_v34 = vshll.u32 %v189_v28, 8  ;;  %v345_v37 = vor.u32 8388608, %v344_v31 }
  0x34   : > { %vm192_vm3 = vcmp.gt.s32.totalorder %v191_v29, 0  ;;  %v347_v32 = vadd.s32 1, %v721_v30  ;;  %v230_v49 = vand.u32 65535, %v853_v34  ;;  %v231_v23 = vshrl.u32 %v853_v34, 16 }
  0x35   : > { %v193_v33 = vsel %vm192_vm3, %v191_v29, 0  ;;  %v869_v24 = vshll.u32 %v345_v37, 8 }
  0x36   : > { %v195_v35 = vand.u32 31, %v193_v33  ;;  %vm348_vm4 = vcmp.gt.s32.totalorder %v347_v32, 0  ;;  %v194_v36 = vshrl.u32 %v193_v33, 5 }
  0x37   : > { %v349_v50 = vsel %vm348_vm4, %v347_v32, 0 }
  0x38   : > { %v196_v38 = vsub.s32 32, %v195_v35  ;;  %v198_v40 = vshll.u32 %v757_v39, %v195_v35  ;;  %v201_v42 = vshll.u32 %v758_v41, %v195_v35  ;;  %v204_v44 = vshll.u32 %v759_v43, %v195_v35 }
  0x39   : > { %v207_v46 = vshll.u32 %v760_v45, %v195_v35  ;;  %v210_v48 = vshll.u32 %v761_v47, %v195_v35  ;;  %vm213_vm5 = vcmp.lt.s32.totalorder %v194_v36, 1  ;;  %vm214_vm6 = vcmp.lt.s32.totalorder %v194_v36, 2 }
  0x3a   : > { %v197_v51 = vshrl.u32 %v757_v39, %v196_v38  ;;  %v199_v52 = vshrl.u32 %v758_v41, %v196_v38  ;;  %v202_v53 = vshrl.u32 %v759_v43, %v196_v38  ;;  %v205_v54 = vshrl.u32 %v760_v45, %v196_v38 }
  0x3b   : > { %v208_v55 = vshrl.u32 %v761_v47, %v196_v38  ;;  %v211_v57 = vshrl.u32 %v762_v56, %v196_v38  ;;  %vm216_vm7 = vcmp.lt.s32.totalorder %v194_v36, 4  ;;  %vm215_vm8 = vcmp.lt.s32.totalorder %v194_v36, 3 }
  0x3c   : > { %v200_v58 = vor.u32 %v199_v52, %v198_v40  ;;  %v203_v59 = vor.u32 %v202_v53, %v201_v42  ;;  %v206_v60 = vor.u32 %v205_v54, %v204_v44  ;;  %v863_v63 = vand.u32 31, %v349_v50 }
  0x3d   : > { %v209_v61 = vor.u32 %v208_v55, %v207_v46  ;;  %v212_v62 = vor.u32 %v211_v57, %v210_v48  ;;  %v876_v29 = vshrl.u32 %v349_v50, 5 }
  0x3e   : > { %v217_v9 = vsel %vm213_vm5, %v197_v51, %v200_v58  ;;  %v218_v10 = vsel %vm216_vm7, %v206_v60, 2102212464  ;;  %v221_v11 = vsel %vm213_vm5, %v200_v58, %v203_v59  ;;  %v225_v12 = vsel %vm213_vm5, %v203_v59, %v206_v60 }
  0x3f   : > { %v219_v13 = vsel %vm215_vm8, %v203_v59, %v218_v10  ;;  %v222_v14 = vsel %vm216_vm7, %v209_v61, 920167782  ;;  %v226_v16 = vsel %vm216_vm7, %v212_v62, 1326507024  ;;  %v866_v17 = vsub.s32 32, %v863_v63 }
  0x40   : > { %v223_v20 = vsel %vm215_vm8, %v206_v60, %v222_v14  ;;  %v227_v22 = vsel %vm215_vm8, %v209_v61, %v226_v16  ;;  %v872_v26 = vsel %vm214_vm6, %v217_v9, %v219_v13  ;;  %v354_v35 = vshll.u32 %v757_v39, %v863_v63 }
  0x41   : > { %v224_v27 = vsel %vm214_vm6, %v221_v11, %v223_v20  ;;  %v228_v28 = vsel %vm214_vm6, %v225_v12, %v227_v22  ;;  %v355_v38 = vshrl.u32 %v758_v41, %v866_v17  ;;  %v357_v37 = vshll.u32 %v758_v41, %v863_v63 }
  0x42   : > { %v232_v30 = vand.u32 65535, %v228_v28  ;;  %v233_v31 = vshrl.u32 %v228_v28, 16  ;;  %v254_v32 = vand.u32 65535, %v224_v27  ;;  %v255_v33 = vshrl.u32 %v224_v27, 16 }
  0x43   : > { %v358_v40 = vshrl.u32 %v759_v43, %v866_v17  ;;  %v360_v36 = vshll.u32 %v759_v43, %v863_v63  ;;  %v884_v9 = vor.u32 %v355_v38, %v354_v35  ;;  %v763_v10 = vmov 0  }
  0x44   : > { %v234_v42 = vmul.u32 %v232_v30, %v230_v49  ;;  %v235_v44 = vmul.u32 %v233_v31, %v230_v49  ;;  %v236_v46 = vmul.u32 %v232_v30, %v231_v23  ;;  %v237_v48 = vmul.u32 %v233_v31, %v231_v23 }
  0x45   : > { %v256_v50 = vmul.u32 %v254_v32, %v230_v49  ;;  %v257_v51 = vmul.u32 %v255_v33, %v230_v49  ;;  %v258_v52 = vmul.u32 %v254_v32, %v231_v23  ;;  %v259_v57 = vmul.u32 %v255_v33, %v231_v23 }
  0x46   : > { %v238_v53 = vshll.u32 %v235_v44, 16  ;;  %v239_v54 = vshrl.u32 %v235_v44, 16  ;;  %v240_v55 = vshll.u32 %v236_v46, 16  ;;  %v241_v58 = vshrl.u32 %v236_v46, 16 }
  0x47   : > { %v260_v59 = vshll.u32 %v257_v51, 16  ;;  %v261_v60 = vshrl.u32 %v257_v51, 16  ;;  %v262_v61 = vshll.u32 %v258_v52, 16  ;;  %v263_v62 = vshrl.u32 %v258_v52, 16 }
  0x48   : > { %vm242_vm9 = vc.u32 %v234_v42, %v238_v53  ;;  %v244_v41 = vadd.s32 %v238_v53, %v234_v42  ;;  %v361_v49 = vshrl.u32 %v760_v45, %v866_v17  ;;  %v363_v14 = vshll.u32 %v760_v45, %v863_v63 }
  0x49   : > { %v243_v43 = vsel %vm242_vm9, 1, %v763_v10  ;;  %vm264_vm10 = vc.u32 %v256_v50, %v260_v59  ;;  %v266_v11 = vadd.s32 %v260_v59, %v256_v50  ;;  %v893_v22 = vor.u32 %v358_v40, %v357_v37 }
  0x4a   : > { %v245_v12 = vadd.s32 %v243_v43, %v237_v48  ;;  %vm246_vm11 = vc.u32 %v244_v41, %v240_v55  ;;  %v265_v13 = vsel %vm264_vm10, 1, %v763_v10  ;;  %v362_v28 = vor.u32 %v361_v49, %v360_v36 }
  0x4b   : > { %v247_v16 = vsel %vm246_vm11, 1, %v763_v10  ;;  %v267_v20 = vadd.s32 %v265_v13, %v259_v57  ;;  %vm268_vm12 = vc.u32 %v266_v11, %v262_v61  ;;  %v364_v30 = vshrl.u32 %v761_v47, %v866_v17 }
  0x4c   : > { %v249_v23 = vadd.s32 %v247_v16, %v245_v12  ;;  %v269_v27 = vsel %vm268_vm12, 1, %v763_v10  ;;  %v366_v32 = vshll.u32 %v761_v47, %v863_v63  ;;  %v367_v45 = vshrl.u32 %v762_v56, %v866_v17 }
  0x4d   : > { %v271_v31 = vadd.s32 %v269_v27, %v267_v20  ;;  %vm369_vm13 = vcmp.lt.s32.totalorder %v876_v29, 1  ;;  %v903_v35 = vadd.s32 %v266_v11, %v262_v61  ;;  %v365_v38 = vor.u32 %v364_v30, %v363_v14 }
  0x4e   : > { %v250_v33 = vadd.s32 %v249_v23, %v239_v54  ;;  %vm371_vm14 = vcmp.lt.s32.totalorder %v876_v29, 3  ;;  %v368_v40 = vor.u32 %v367_v45, %v366_v32  ;;  %vm370_vm15 = vcmp.lt.s32.totalorder %v876_v29, 2 }
  0x4f   : > { %v272_v37 = vadd.s32 %v271_v31, %v261_v60  ;;  %vm372_vm1 = vcmp.lt.s32.totalorder %v876_v29, 4  ;;  %v377_v47 = vsel %vm369_vm13, %v884_v9, %v893_v22  ;;  %v386_v46 = vand.u32 65535, %v869_v24 }
  0x50   : > { %v908_v42 = vadd.s32 %v250_v33, %v241_v58  ;;  %v378_v56 = vsel %vm372_vm1, %v365_v38, 920167782  ;;  %v387_v36 = vshrl.u32 %v869_v24, 16  ;;  %v274_v48 = vmul.u32 %v853_v34, %v872_v26 }
  0x51   : > { %v273_v63 = vadd.s32 %v272_v37, %v263_v62  ;;  %v379_v44 = vsel %vm371_vm14, %v362_v28, %v378_v56  ;;  %v381_v51 = vsel %vm369_vm13, %v893_v22, %v362_v28  ;;  %v382_v53 = vsel %vm372_vm1, %v368_v40, 1326507024 }
  0x52   : > { %vm276_vm2 = vc.u32 %v908_v42, %v903_v35  ;;  %v380_v50 = vsel %vm370_vm15, %v377_v47, %v379_v44  ;;  %v383_v57 = vsel %vm371_vm14, %v365_v38, %v382_v53  ;;  %v353_v45 = vshrl.u32 %v757_v39, %v866_v17 }
  0x53   : > { %v277_v52 = vadd.s32 1, %v273_v63  ;;  %v410_v54 = vand.u32 65535, %v380_v50  ;;  %v411_v55 = vshrl.u32 %v380_v50, 16  ;;  %v384_v26 = vsel %vm370_vm15, %v381_v51, %v383_v57 }
  0x54   : > { %v388_v60 = vand.u32 65535, %v384_v26  ;;  %v389_v61 = vshrl.u32 %v384_v26, 16  ;;  %v374_v38 = vsel %vm372_vm1, %v362_v28, 2102212464  ;;  %v373_v53 = vsel %vm369_vm13, %v353_v45, %v884_v9 }
  0x55   : > { %v278_v34 = vsel %vm276_vm2, %v277_v52, %v273_v63  ;;  %v413_v58 = vmul.u32 %v411_v55, %v386_v46  ;;  %v412_v41 = vmul.u32 %v410_v54, %v386_v46  ;;  %v414_v62 = vmul.u32 %v410_v54, %v387_v36 }
  0x56   : > { %v279_v59 = vadd.s32 %v278_v34, %v274_v48  ;;  %v390_v49 = vmul.u32 %v388_v60, %v386_v46  ;;  %v391_v12 = vmul.u32 %v389_v61, %v386_v46  ;;  %v392_v13 = vmul.u32 %v388_v60, %v387_v36 }
  0x57   : > { %v416_v43 = vshll.u32 %v413_v58, 16  ;;  %v418_v14 = vshll.u32 %v414_v62, 16  ;;  %v393_v20 = vmul.u32 %v389_v61, %v387_v36  ;;  %v415_v30 = vmul.u32 %v411_v55, %v387_v36 }
  0x58   : > { %v280_v11 = vadd.s32 536870912, %v279_v59  ;;  %v394_v23 = vshll.u32 %v391_v12, 16  ;;  %v396_v27 = vshll.u32 %v392_v13, 16  ;;  %v395_v56 = vshrl.u32 %v391_v12, 16 }
  0x59   : > { %vm420_vm3 = vc.u32 %v412_v41, %v416_v43  ;;  %v422_v31 = vadd.s32 %v416_v43, %v412_v41  ;;  %v417_v46 = vshrl.u32 %v413_v58, 16  ;;  %v397_v48 = vshrl.u32 %v392_v13, 16 }
  0x5a   : > { %v935_v16 = vshrl.u32 %v280_v11, 30  ;;  %vm398_vm4 = vc.u32 %v390_v49, %v394_v23  ;;  %v400_v33 = vadd.s32 %v394_v23, %v390_v49  ;;  %v421_v40 = vsel %vm420_vm3, 1, %v763_v10 }
  0x5b   : > { %v399_v37 = vsel %vm398_vm4, 1, %v763_v10  ;;  %vm424_vm5 = vc.u32 %v422_v31, %v418_v14  ;;  %v423_v36 = vadd.s32 %v421_v40, %v415_v30  ;;  %v419_v28 = vshrl.u32 %v414_v62, 16 }
  0x5c   : > { %v282_v32 = vshll.u32 %v935_v16, 30  ;;  %v401_v63 = vadd.s32 %v399_v37, %v393_v20  ;;  %vm402_vm6 = vc.u32 %v400_v33, %v396_v27  ;;  %v425_v39 = vsel %vm424_vm5, 1, %v763_v10 }
  0x5d   : > { %v403_v44 = vsel %vm402_vm6, 1, %v763_v10  ;;  %v427_v51 = vadd.s32 %v425_v39, %v423_v36  ;;  %v375_v54 = vsel %vm371_vm14, %v893_v22, %v374_v38  ;;  %v426_v34 = vadd.s32 %v422_v31, %v418_v14 }
  0x5e   : > { %v283_v47 = vsub.s32 %v279_v59, %v282_v32  ;;  %v405_v50 = vadd.s32 %v403_v44, %v401_v63  ;;  %v376_v59 = vsel %vm370_vm15, %v373_v53, %v375_v54  ;;  %v275_v61 = vadd.s32 %v903_v35, %v908_v42 }
  0x5f   : > { %v428_v26 = vadd.s32 %v427_v51, %v417_v46  ;;  %v430_v62 = vmul.u32 %v869_v24, %v376_v59  ;;  %vm183_vm10 = vcmp.lt.s32.totalorder %v839_v18, 0  ;;  %vm182_vm11 = vcmp.le.f32.partialorder %v842_v19, 0.7853982 }
  0x60   : > { %vm284_vm7 = vcmp.lt.s32.totalorder %v283_v47, 0  ;;  %v285_v17 = vsub.s32 0, %v283_v47  ;;  %v406_v55 = vadd.s32 %v405_v50, %v395_v56  ;;  %v305_v63 = vsub.s32 4, %v935_v16 }
  0x61   : > { %v429_v60 = vadd.s32 %v428_v26, %v419_v28  ;;  %v970_v51 = vmul.f32 %v839_v18, %v828_v8  ;;  %vm339_vm14 = vcmp.lt.s32.totalorder %v846_v21, 0  ;;  %vm986_vm15 = vcmp.le.f32.partialorder %v337_v25, 0.7853982 }
  0x62   : > { %v286_v52 = vsel %vm284_vm7, %v285_v17, %v283_v47  ;;  %v407_v10 = vadd.s32 %v406_v55, %v397_v48  ;;  %v306_v50 = vsel %vm183_vm10, %v305_v63, %v935_v16  ;;  %vm324_vm3 = vweird.f32 %v839_v18 }
  0x63   : > { %v287_v57 = vclz %v286_v52  ;;  %v433_v9 = vadd.s32 1, %v429_v60  ;;  %745 = vrcp.f32 %v970_v51  ;;  %vm546_vm5 = vweird.f32 %v970_v51 }
  0x64   : > { %vm432_vm9 = vc.u32 %v407_v10, %v426_v34  ;;  %v431_v48 = vadd.s32 %v426_v34, %v407_v10  ;;  %v308_v34 = vsel %vm182_vm11, 0, %v306_v50  ;;  %747 = vrcp.f32 %v828_v8 }
  0x65   : > { %v719_v58 = vadd.s32 4294967294, %v287_v57  ;;  %v434_v49 = vsel %vm432_vm9, %v433_v9, %v429_v60 }
  0x66   : > { %v435_v14 = vadd.s32 %v434_v49, %v430_v62 }
  0x67   : > { %vm720_vm8 = vcmp.lt.s32.totalorder %v719_v58, 0 }
  0x68   : > { %v290_v41 = vsel %vm720_vm8, 0, %v719_v58  ;;  %v436_v23 = vadd.s32 536870912, %v435_v14 }
  0x69   : > { %v291_v22 = vsub.s32 32, %v290_v41  ;;  %v292_v43 = vshll.u32 %v283_v47, %v290_v41  ;;  %v295_v11 = vsub.s32 4294967266, %v290_v41  ;;  %v325_v41 = vadd.s32 3, %v308_v34 }
  0x6a   : > { %v437_v31 = vshrl.u32 %v436_v23, 30 }
  0x6b   : > { %v293_v12 = vshrl.u32 %v275_v61, %v291_v22  ;;  %v296_v13 = vadd.s32 127, %v295_v11 }
  0x6c   : > { %v438_v42 = vshll.u32 %v437_v31, 30  ;;  %v461_v16 = vsub.s32 4, %v437_v31 }
  0x6d   : > { %v294_v20 = vor.u32 %v293_v12, %v292_v43  ;;  %v297_v29 = vshll.u32 %v296_v13, 23  ;;  %v977_v43 = vpop.eup %743 }
  0x6e   : > { %v439_v45 = vsub.s32 %v435_v14, %v438_v42  ;;  %v462_v12 = vsel %vm339_vm14, %v461_v16, %v437_v31  ;;  %v498_v31 = vmul.f32 %v977_v43, %v839_v18  ;;  %vm503_vm8 = vweird.f32 %v977_v43 }
  0x6f   : > { %v298_v27 = vor.u32 4788187, %v297_v29  ;;  %v301_v30 = vcvt.s32.f32 %v294_v20  ;;  %v982_v20 = vpop.eup %745  ;;  %v326_v29 = vand.u32 3, %v325_v41 }
  0x70   : > { %vm440_vm12 = vcmp.lt.s32.totalorder %v439_v45, 0  ;;  %v441_v33 = vsub.s32 0, %v439_v45  ;;  %vm547_vm6 = vweird.f32 %v982_v20 }
  0x71   : > { %v299_v35 = vand.u32 2147483647, %v298_v27  ;;  %vm328_vm1 = vcmp.eq.s32.totalorder %v326_v29, 0  ;;  %vm331_vm2 = vcmp.eq.s32.totalorder %v326_v29, 2  ;;  %vm327_vm4 = vcmp.lt.s32.totalorder %v326_v29, 2  ;;  %vm1025_vm7 = vmor %vm546_vm5, %vm547_vm6 }
  0x72   : > { %v442_v40 = vsel %vm440_vm12, %v441_v33, %v439_v45  ;;  %v996_v33 = vpop.eup %747  ;;  %vm507_vm12 = vcmp.eq.f32.partialorder %v842_v19, 8.507059e+37  ;;  %v1056_v29 = vld [vmem:[%s151_s18] sm:$0x1] }
  0x73   : > { %v302_v32 = vmul.f32 %v301_v30, %v299_v35  ;;  %v443_v56 = vclz %v442_v40  ;;  %v464_v30 = vsel %vm986_vm15, 0, %v462_v12 }
  0x75   : > { %v303_v24 = vxor.u32 2147483648, %v302_v32  ;;  %v722_v36 = vadd.s32 4294967294, %v443_v56 }
  0x77   : > { %v304_v38 = vsel %vm183_vm10, %v303_v24, %v302_v32  ;;  %vm723_vm13 = vcmp.lt.s32.totalorder %v722_v36, 0  ;;  %v481_v24 = vadd.s32 3, %v464_v30  ;;  %v1061_v30 = vld [vmem:[%s151_s18 + $0x2] sm:$0x1] }
  0x78   : > { %v307_v37 = vsel %vm182_vm11, %v839_v18, %v304_v38  ;;  %v446_v28 = vsel %vm723_vm13, 0, %v722_v36  ;;  %v499_v38 = vsub.f32 1.0, %v498_v31  ;;  %v520_v36 = vmul.f32 %v996_v33, %v828_v8  ;;  %vm1049_vm11 = vmor %vm324_vm3, %vm503_vm8  ;;  %v1063_v31 = vld [vmem:[%s151_s18 + $0x3] sm:$0x1] }
  0x79   : > { %v309_v47 = vmul.f32 %v307_v37, %v307_v37  ;;  %v447_v54 = vsub.s32 32, %v446_v28  ;;  %v448_v55 = vshll.u32 %v439_v45, %v446_v28  ;;  %v451_v57 = vsub.s32 4294967266, %v446_v28 }
  0x7a   : > { %v542_v45 = vmul.f32 %v982_v20, %v970_v51  ;;  %vm480_vm13 = vweird.f32 %v846_v21 }
  0x7b   : > { %v310_v44 = vmul.f32 -0.001358992, %v309_v47  ;;  %v317_v46 = vmul.f32 -0.00019511016, %v309_v47  ;;  %v449_v58 = vshrl.u32 %v431_v48, %v447_v54  ;;  %v452_v59 = vadd.s32 127, %v451_v57 }
  0x7c   : > { %v543_v63 = vsub.f32 1.0, %v542_v45  ;;  %v508_v54 = vand.u32 2147483648, %v839_v18 }
  0x7d   : > { %v311_v39 = vadd.f32 0.041655596, %v310_v44  ;;  %v318_v17 = vadd.f32 0.008332121, %v317_v46  ;;  %v450_v9 = vor.u32 %v449_v58, %v448_v55  ;;  %v453_v62 = vshll.u32 %v452_v59, 23 }
  0x7e   : > { %v1008_v46 = vand.u32 3, %v481_v24  ;;  %v544_v48 = vmul.f32 %v982_v20, %v543_v63  ;;  %v535_v55 = vmul.f32 0.008333334, %v822_v7  ;;  %v493_v59 = vmul.f32 0.16666667, %v822_v7 }
  0x7f   : > { %v312_v52 = vmul.f32 %v311_v39, %v309_v47  ;;  %v319_v53 = vmul.f32 %v318_v17, %v309_v47  ;;  %v454_v11 = vor.u32 4788187, %v453_v62  ;;  %v457_v49 = vcvt.s32.f32 %v450_v9 }
  0x80   : > { %v1016_v39 = vmul.f32 %v822_v7, %v822_v7  ;;  %v500_v17 = vmul.f32 %v977_v43, %v499_v38  ;;  %v545_v57 = vadd.f32 %v982_v20, %v544_v48  ;;  %vm487_vm9 = vcmp.eq.s32.totalorder %v1008_v46, 2 }
  0x81   : > { %v313_v26 = vadd.f32 -0.4999988, %v312_v52  ;;  %v320_v10 = vadd.f32 -0.16666654, %v319_v53  ;;  %v455_v27 = vand.u32 2147483647, %v454_v11 }
  0x82   : > { %v550_v53 = vand.u32 2147483647, %v970_v51  ;;  %v549_v62 = vsel %vm1025_vm7, %v982_v20, %v545_v57  ;;  %v509_v11 = vor.u32 1.1754944e-38, %v508_v54  ;;  %v537_v12 = vmul.f32 0.0001984127, %v1016_v39 }
  0x83   : > { %v314_v60 = vmul.f32 %v313_v26, %v309_v47  ;;  %v321_v61 = vmul.f32 %v320_v10, %v309_v47  ;;  %v458_v35 = vmul.f32 %v457_v49, %v455_v27  ;;  %v552_v26 = vand.u32 2147483648, %v970_v51  ;;  %v1059_v27 = vld [vmem:[%s151_s18 + $0x1] sm:$0x1] }
  0x84   : > { %vm551_vm10 = vcmp.eq.f32.partialorder %v550_v53, 8.507059e+37  ;;  %v536_v49 = vsub.f32 0.16666667, %v535_v55  ;;  %644 = vst [vmem:[%s1045_s21 + $0x3] sm:$0x1] %v1063_v31 }
  0x85   : > { %v322_v22 = vadd.f32 1.0, %v321_v61  ;;  %v315_v13 = vadd.f32 1.0, %v314_v60  ;;  %v459_v25 = vxor.u32 2147483648, %v458_v35  ;;  %v501_v60 = vadd.f32 %v977_v43, %v500_v17 }
  0x86   : > { %v521_v61 = vsub.f32 1.0, %v520_v36  ;;  %v553_v9 = vor.u32 1.1754944e-38, %v552_v26  ;;  %v515_v57 = vmul.f32 0.0013888889, %v1016_v39 }
  0x87   : > { %v323_v14 = vmul.f32 %v322_v22, %v307_v37  ;;  %v332_v32 = vxor.u32 2147483648, %v315_v13  ;;  %v460_v37 = vsel %vm339_vm14, %v459_v25, %v458_v35  ;;  %vm524_vm14 = vweird.f32 %v828_v8  ;;  %v156_v22 = vld [vmem:[%s793_s14] sm:$0x1] }
  0x88   : > { %v1004_v56 = vsel %vm986_vm15, %v846_v21, %v460_v37  ;;  %v554_v23 = vsel %vm551_vm10, %v553_v9, %v549_v62  ;;  %v522_v45 = vmul.f32 %v996_v33, %v521_v61  ;;  %vm525_vm15 = vweird.f32 %v996_v33 }
  0x89   : > { %v329_v42 = vxor.u32 2147483648, %v323_v14  ;;  %v333_v47 = vsel %vm331_vm2, %v332_v32, %v323_v14  ;;  %v465_v44 = vmul.f32 %v1004_v56, %v1004_v56  ;;  %v505_v32 = vsel %vm1049_vm11, %v977_v43, %v501_v60  ;;  %vm1091_vm2 = vmor %vm524_vm14, %vm525_vm15 }
  0x8a   : > { %v1077_v25 = vadd.f32 %v814_v5, %v806_v3  ;;  %v538_v37 = vadd.f32 %v537_v12, %v536_v49  ;;  %v494_v43 = vsub.f32 1.0, %v493_v59  ;;  %v510_v63 = vsel %vm507_vm12, %v509_v11, %v505_v32  ;;  %v157_v11 = vld [vmem:[%s793_s14 + $0x1] sm:$0x1]  ;;  %v158_v49 = vld [vmem:[%s793_s14 + $0x2] sm:$0x1] }
  0x8b   : > { %v330_v40 = vsel %vm328_vm1, %v315_v13, %v329_v42  ;;  %v466_v28 = vmul.f32 -0.001358992, %v465_v44  ;;  %v473_v52 = vmul.f32 -0.00019511016, %v465_v44  ;;  %v528_v3 = vand.u32 2147483647, %v828_v8 }
  0x8c   : > { %v334_v50 = vsel %vm327_vm4, %v330_v40, %v333_v47  ;;  %v495_v47 = vmul.f32 0.008333334, %v1016_v39  ;;  %vm484_vm1 = vcmp.eq.s32.totalorder %v1008_v46, 0  ;;  %v563_v48 = vsub.f32 0.0, %v1077_v25 }
  0x8d   : > { %v467_v10 = vadd.f32 0.041655596, %v466_v28  ;;  %v474_v58 = vadd.f32 0.008332121, %v473_v52  ;;  %v335_v16 = vsel %vm324_vm3, nan, %v334_v50  ;;  %vm483_vm3 = vcmp.lt.s32.totalorder %v1008_v46, 2 }
  0x8e   : > { %v539_v20 = vsub.f32 %v839_v18, %v335_v16  ;;  %v560_v18 = vadd.f32 %v814_v5, %v810_v4  ;;  %v523_v4 = vadd.f32 %v996_v33, %v522_v45  ;;  %v496_v53 = vadd.f32 %v495_v47, %v494_v43 }
  0x8f   : > { %v468_v51 = vmul.f32 %v467_v10, %v465_v44  ;;  %v475_v41 = vmul.f32 %v474_v58, %v465_v44  ;;  %v511_v54 = vmul.f32 %v510_v63, %v335_v16  ;;  %vm529_vm4 = vcmp.eq.f32.partialorder %v528_v3, 8.507059e+37 }
  0x90   : > { %v555_v40 = vmul.f32 %v554_v23, %v539_v20  ;;  %v561_v19 = vsub.f32 0.0, %v560_v18  ;;  %v527_v26 = vsel %vm1091_vm2, %v996_v33, %v523_v4  ;;  %v557_v8 = vmul.f32 %v799_v1, %v796_v0 }
  0x91   : > { %v469_v13 = vadd.f32 -0.4999988, %v468_v51  ;;  %v476_v14 = vadd.f32 -0.16666654, %v475_v41  ;;  %v512_v39 = vsel %vm167_vm0, %v496_v53, %v511_v54  ;;  %v559_v9 = vmul.f32 %v802_v2, %v799_v1 }
  0x92   : > { %v556_v52 = vsel %vm167_vm0, %v538_v37, %v555_v40  ;;  %v577_v20 = vmul.f32 %v512_v39, %v796_v0 }
  0x93   : > { %v470_v35 = vmul.f32 %v469_v13, %v465_v44  ;;  %v477_v42 = vmul.f32 %v476_v14, %v465_v44  ;;  %v513_v44 = vmul.f32 0.041666668, %v822_v7  ;;  %v583_v46 = vmul.f32 %v561_v19, %v556_v52 }
  0x94   : > { %v592_v58 = vmul.f32 %v563_v48, %v556_v52  ;;  %v568_v13 = vmul.f32 %v512_v39, %v802_v2  ;;  %v571_v14 = vmul.f32 %v512_v39, %v799_v1  ;;  %v585_v23 = vmul.f32 %v557_v8, %v556_v52 }
  0x95   : > { %v471_v24 = vadd.f32 1.0, %v470_v35  ;;  %v478_v38 = vadd.f32 1.0, %v477_v42  ;;  %v514_v55 = vsub.f32 0.5, %v513_v44  ;;  %v584_v41 = vadd.f32 1.0, %v583_v46 }
  0x96   : > { %v593_v62 = vadd.f32 1.0, %v592_v58  ;;  %v594_v42 = vmul.f32 %v559_v9, %v556_v52 }
  0x97   : > { %v479_v36 = vmul.f32 %v478_v38, %v1004_v56  ;;  %v488_v17 = vxor.u32 2147483648, %v471_v24  ;;  %v564_v56 = vsub.f32 0.0, %v818_v6  ;;  %v531_v6 = vor.u32 1.1754944e-38, %v179_v15 }
  0x98   : > { %v516_v60 = vadd.f32 %v515_v57, %v514_v55  ;;  %v558_v15 = vmul.f32 %v802_v2, %v796_v0  ;;  %v601_v45 = vmul.f32 %v584_v41, %v156_v22  ;;  %v607_v18 = vmul.f32 %v593_v62, %v157_v11 }
  0x99   : > { %v485_v50 = vxor.u32 2147483648, %v479_v36  ;;  %v489_v28 = vsel %vm487_vm9, %v488_v17, %v479_v36  ;;  %v599_v59 = vmul.f32 %v564_v56, %v556_v52  ;;  %v532_v33 = vsel %vm529_vm4, %v531_v6, %v527_v26 }
  0x9a   : > { %v588_v35 = vmul.f32 %v558_v15, %v556_v52 }
  0x9b   : > { %v486_v34 = vsel %vm484_vm1, %v471_v24, %v485_v50  ;;  %v600_v21 = vadd.f32 1.0, %v599_v59 }
  0x9c   : > { %v490_v10 = vsel %vm483_vm3, %v486_v34, %v489_v28 }
  0x9d   : > { %v491_v16 = vsel %vm480_vm13, nan, %v490_v10  ;;  %v614_v25 = vmul.f32 %v600_v21, %v158_v49 }
  0x9e   : > { %v517_v61 = vmul.f32 2.0, %v491_v16 }
  0xa0   : > { %v518_v51 = vmul.f32 %v517_v61, %v491_v16 }
  0xa2   : > { %v533_v12 = vmul.f32 %v532_v33, %v518_v51 }
  0xa4   : > { %v534_v32 = vsel %vm167_vm0, %v516_v60, %v533_v12 }
  0xa5   : > { %v565_v24 = vmul.f32 %v561_v19, %v534_v32  ;;  %v567_v38 = vmul.f32 %v557_v8, %v534_v32  ;;  %v570_v37 = vmul.f32 %v558_v15, %v534_v32  ;;  %v574_v40 = vmul.f32 %v563_v48, %v534_v32 }
  0xa6   : > { %v576_v43 = vmul.f32 %v559_v9, %v534_v32  ;;  %v581_v47 = vmul.f32 %v564_v56, %v534_v32  ;;  %v586_v63 = vmul.f32 %v534_v32, %v802_v2  ;;  %v589_v44 = vmul.f32 %v534_v32, %v799_v1 }
  0xa7   : > { %v566_v36 = vadd.f32 1.0, %v565_v24  ;;  %v569_v17 = vsub.f32 %v567_v38, %v568_v13  ;;  %v572_v4 = vadd.f32 %v571_v14, %v570_v37  ;;  %v573_v3 = vadd.f32 %v568_v13, %v567_v38 }
  0xa8   : > { %v575_v5 = vadd.f32 1.0, %v574_v40  ;;  %v578_v7 = vsub.f32 %v576_v43, %v577_v20  ;;  %v579_v50 = vsub.f32 %v570_v37, %v571_v14  ;;  %v580_v28 = vadd.f32 %v577_v20, %v576_v43 }
  0xa9   : > { %v582_v52 = vadd.f32 1.0, %v581_v47  ;;  %v587_v53 = vsub.f32 %v585_v23, %v586_v63  ;;  %v590_v19 = vadd.f32 %v589_v44, %v588_v35  ;;  %v591_v54 = vadd.f32 %v586_v63, %v585_v23 }
  0xaa   : > { %v595_v48 = vmul.f32 %v534_v32, %v796_v0  ;;  %v597_v55 = vsub.f32 %v588_v35, %v589_v44  ;;  %v620_v56 = vmul.f32 %v1056_v29, %v566_v36  ;;  %v621_v2 = vmul.f32 %v1059_v27, %v569_v17 }
  0xab   : > { %v602_v1 = vmul.f32 %v587_v53, %v157_v11  ;;  %v604_v57 = vmul.f32 %v590_v19, %v158_v49  ;;  %v606_v34 = vmul.f32 %v591_v54, %v156_v22  ;;  %v623_v26 = vmul.f32 %v1061_v30, %v572_v4 }
  0xac   : > { %v596_v6 = vsub.f32 %v594_v42, %v595_v48  ;;  %v598_v10 = vadd.f32 %v595_v48, %v594_v42  ;;  %v611_v46 = vmul.f32 %v597_v55, %v156_v22  ;;  %v622_v58 = vadd.f32 %v621_v2, %v620_v56 }
  0xad   : > { %v603_v59 = vadd.f32 %v602_v1, %v601_v45  ;;  %v608_v16 = vadd.f32 %v607_v18, %v606_v34  ;;  %v627_v39 = vmul.f32 %v1056_v29, %v573_v3  ;;  %v628_v0 = vmul.f32 %v1059_v27, %v575_v5 }
  0xae   : > { %v609_v60 = vmul.f32 %v596_v6, %v158_v49  ;;  %v612_v61 = vmul.f32 %v598_v10, %v157_v11  ;;  %v624_v33 = vadd.f32 %v623_v26, %v622_v58  ;;  %v630_v8 = vmul.f32 %v1061_v30, %v578_v7 }
  0xaf   : > { %v605_v15 = vadd.f32 %v604_v57, %v603_v59  ;;  %v629_v9 = vadd.f32 %v628_v0, %v627_v39  ;;  %v634_v51 = vmul.f32 %v1056_v29, %v579_v50  ;;  %v635_v41 = vmul.f32 %v1059_v27, %v580_v28 }
  0xb0   : > { %v610_v62 = vadd.f32 %v609_v60, %v608_v16  ;;  %v613_v21 = vadd.f32 %v612_v61, %v611_v46  ;;  %v637_v22 = vmul.f32 %v1061_v30, %v582_v52 }
  0xb1   : > { %v625_v12 = vmul.f32 %v1063_v31, %v605_v15  ;;  %v631_v49 = vadd.f32 %v630_v8, %v629_v9  ;;  %v636_v11 = vadd.f32 %v635_v41, %v634_v51 }
  0xb2   : > { %v615_v13 = vadd.f32 %v614_v25, %v613_v21  ;;  %v632_v14 = vmul.f32 %v1063_v31, %v610_v62 }
  0xb3   : > { %v626_v20 = vadd.f32 %v625_v12, %v624_v33  ;;  %v638_v23 = vadd.f32 %v637_v22, %v636_v11 }
  0xb4   : > { %v633_v35 = vadd.f32 %v632_v14, %v631_v49  ;;  %v639_v29 = vmul.f32 %v1063_v31, %v615_v13 }
  0xb5   : > { %641 = vst [vmem:[%s1045_s21] sm:$0x1] %v626_v20 }
  0xb6   : > { %v640_v42 = vadd.f32 %v639_v29, %v638_v23  ;;  %642 = vst [vmem:[%s1045_s21 + $0x1] sm:$0x1] %v633_v35 }
  0xb8   : > { %643 = vst [vmem:[%s1045_s21 + $0x2] sm:$0x1] %v640_v42 }
  0xb9 PF: > { %s12_s9 = sadd.s32 1, %s755_s9  }
  0xba   : > { %p9_p4 = scmp.ge.s32.totalorder %s12_s9, 4  }
  0xbc   :  { %11 = sbr.rel (!%p9_p4) target bundleno = 1 (0x1), region = 61 }

</bundles_post_ra>
